<compile_context>
chip_gen: v7x
topology: tpu7x:2x2x1
jax: 0.10.0
libtpu: 0.0.40
codegen_flags: <defaults>
</compile_context>

<pallas_src>
import functools
import math

import jax
import jax.numpy as jnp
from jax import lax
from jax.experimental import pallas as pl
from jax.experimental.pallas import tpu as pltpu


def _attn_group_kernel(x_ref, wq_ref, wk_ref, wv_ref, mask_ref, o_ref, *,
                       heads_per_group, head_size, scale):
    # x_ref   : (S, H)   hidden states, one batch element            (VMEM)
    # w*_ref  : (GW, H)  rows of the PyTorch (out, in) weight for this head group
    # mask_ref: (1, S)   additive attention mask over key positions
    # o_ref   : (S, GW)  context slab for this head group (lane-dense)
    x = x_ref[...]
    mxu_dtype = x.dtype  # bf16 inputs -> bf16 MXU (v6e/v7x fast path); f32 -> f32

    # y = x @ W.T via dot_general contracting on the weights' "in" dim, so the
    # PyTorch (out, in) layout is consumed directly — no transpose pass anywhere.
    dn = (((1,), (1,)), ((), ()))
    q = lax.dot_general(x, wq_ref[...], dn, preferred_element_type=jnp.float32)  # (S, GW)
    k = lax.dot_general(x, wk_ref[...], dn, preferred_element_type=jnp.float32)  # (S, GW)
    v = lax.dot_general(x, wv_ref[...], dn, preferred_element_type=jnp.float32)  # (S, GW)

    # Fold 1/sqrt(head_size) into Q once (S*GW multiplies, not nh*S*S).
    qm = (q * scale).astype(mxu_dtype)
    km = k.astype(mxu_dtype)
    vm = v.astype(mxu_dtype)

    mask = mask_ref[...]  # (1, S): broadcasts over query rows (masks key positions)

    parts = []
    for h in range(heads_per_group):  # tiny bounded unroll (typically 2 heads)
        sl = slice(h * head_size, (h + 1) * head_size)
        # scores = q_h @ k_h.T  (scale already folded into q)
        s = lax.dot_general(qm[:, sl], km[:, sl], dn,
                            preferred_element_type=jnp.float32)       # (S, S) f32
        s = s + mask
        s = s - jnp.max(s, axis=-1, keepdims=True)                    # stable softmax
        p = jnp.exp(s)
        denom = jnp.sum(p, axis=-1, keepdims=True)                    # (S, 1)
        ctx = jnp.dot(p.astype(mxu_dtype), vm[:, sl],
                      preferred_element_type=jnp.float32)             # (S, hd)
        # Deferred normalization via EUP reciprocal: normalizes (S, hd), not (S, S).
        parts.append(ctx * pl.reciprocal(denom, approx=True))

    ctx_group = parts[0] if heads_per_group == 1 else jnp.concatenate(parts, axis=-1)
    o_ref[...] = ctx_group.astype(o_ref.dtype)                        # one lane-dense store


def _pick_heads_per_group(num_heads: int, head_size: int) -> int:
    """Smallest group whose lane width (hpg * head_size) is a multiple of 128
    (unmasked, lane-dense slices/stores) and that divides num_heads evenly."""
    for hpg in range(1, num_heads + 1):
        if num_heads % hpg == 0 and (hpg * head_size) % 128 == 0:
            return hpg
    # Tiny models (H < 128): a single group spanning the full hidden dim is the
    # only (8,128)-legal block shape ("block equals full array dims" escape).
    return num_heads


def diffbert_self_attention(hidden_states: jax.Array,
                            wq: jax.Array, wk: jax.Array, wv: jax.Array,
                            attention_mask: jax.Array | None = None, *,
                            num_attention_heads: int) -> jax.Array:
    """hidden_states: (B, S, H); wq/wk/wv: (H, H) in PyTorch (out, in) layout;
    attention_mask: additive key-position mask broadcastable to (B, 1, S);
    returns the context layer (B, S, H)."""
    B, S, H = hidden_states.shape
    if H % num_attention_heads != 0:
        raise ValueError(f"hidden size {H} not divisible by num heads {num_attention_heads}")
    head_size = H // num_attention_heads
    scale = 1.0 / math.sqrt(head_size)

    hpg = _pick_heads_per_group(num_attention_heads, head_size)
    gw = hpg * head_size                      # group width (output/weight slab lanes)
    num_groups = num_attention_heads // hpg

    # --- additive attention mask: key-position only (per-query 4-D masks rejected) ---
    if attention_mask is None:
        mask = jnp.zeros((B, 1, S), dtype=jnp.float32)
    else:
        m = jnp.asarray(attention_mask, dtype=jnp.float32)
        if m.ndim == 4 and (m.shape[1] != 1 or m.shape[2] != 1):
            raise ValueError(
                "per-head / per-query 4-D attention masks are not supported; expected a "
                f"key-position mask broadcastable to (B, 1, S), got shape {m.shape}")
        if m.size != B * S:
            raise ValueError(
                f"attention_mask must be broadcastable to (B, 1, S)={(B, 1, S)}, got {m.shape}")
        mask = m.reshape(B, 1, S)

    kernel = functools.partial(
        _attn_group_kernel,
        heads_per_group=hpg,
        head_size=head_size,
        scale=scale,
    )

    return pl.pallas_call(
        kernel,
        out_shape=jax.ShapeDtypeStruct((B, S, H), hidden_states.dtype),
        grid=(B, num_groups),
        in_specs=[
            pl.BlockSpec((pl.Squeezed(), S, H), lambda b, g: (b, 0, 0)),  # hidden states
            pl.BlockSpec((gw, H), lambda b, g: (g, 0)),                   # Wq rows for group g
            pl.BlockSpec((gw, H), lambda b, g: (g, 0)),                   # Wk rows for group g
            pl.BlockSpec((gw, H), lambda b, g: (g, 0)),                   # Wv rows for group g
            pl.BlockSpec((pl.Squeezed(), 1, S), lambda b, g: (b, 0, 0)),  # additive mask
        ],
        out_specs=pl.BlockSpec((pl.Squeezed(), S, gw), lambda b, g: (b, 0, g)),
        compiler_params=pltpu.CompilerParams(
            dimension_semantics=("parallel", "parallel"),  # batch & head-group both parallel
            vmem_limit_bytes=48 * 1024 * 1024,             # explicit (v5e default is 16 MiB)
        ),
    )(hidden_states, wq, wk, wv, mask)


def _reference(hidden_states, wq, wk, wv, attention_mask, num_heads):
    """Pure-JAX mirror of the PyTorch forward (default path, eval mode)."""
    B, S, H = hidden_states.shape
    hd = H // num_heads

    def split(t):  # (B, S, H) -> (B, nh, S, hd)
        return t.reshape(B, S, num_heads, hd).transpose(0, 2, 1, 3)

    q = split(hidden_states @ wq.T)
    k = split(hidden_states @ wk.T)
    v = split(hidden_states @ wv.T)
    scores = jnp.einsum("bhqd,bhkd->bhqk", q, k) / math.sqrt(hd)
    scores = scores + attention_mask[:, None, None, :]
    probs = jax.nn.softmax(scores, axis=-1)
    ctx = jnp.einsum("bhqk,bhkd->bhqd", probs, v)
    return ctx.transpose(0, 2, 1, 3).reshape(B, S, H)


if __name__ == "__main__":
    # Small shapes consistent with the module; head_size=64 so head pairs form
    # lane-dense 128-wide slabs and the head-group grid path is exercised.
    B, S, H, NH = 2, 16, 256, 4
    key = jax.random.PRNGKey(0)
    kx, kq, kk, kv = jax.random.split(key, 4)

    hidden = jax.random.normal(kx, (B, S, H), dtype=jnp.float32)
    std = 1.0 / math.sqrt(H)
    wq = jax.random.normal(kq, (H, H), dtype=jnp.float32) * std
    wk = jax.random.normal(kk, (H, H), dtype=jnp.float32) * std
    wv = jax.random.normal(kv, (H, H), dtype=jnp.float32) * std

    # Additive attention mask (0 = keep, -1e4 = masked): pad last 4 keys of batch 1.
    attn_mask = jnp.zeros((B, S), dtype=jnp.float32).at[1, 12:].set(-10000.0)

    out = diffbert_self_attention(hidden, wq, wk, wv, attn_mask,
                                  num_attention_heads=NH)
    out = jax.block_until_ready(out)

    ref = _reference(hidden, wq, wk, wv, attn_mask, NH)
    assert out.shape == (B, S, H)
    max_err = jnp.max(jnp.abs(out - ref))
    assert jnp.allclose(out, ref, atol=3e-3, rtol=3e-3), f"mismatch vs reference (max|err|={max_err})"

    print("KERNEL_OK")
</pallas_src>

<mosaic_0001>
module attributes {stable_mosaic.version = 11 : i64} {
  func.func @_attn_group_kernel(%arg0: i32, %arg1: i32, %arg2: memref<1x16x256xf32, #tpu.memory_space<vmem>>, %arg3: memref<128x256xf32, #tpu.memory_space<vmem>>, %arg4: memref<128x256xf32, #tpu.memory_space<vmem>>, %arg5: memref<128x256xf32, #tpu.memory_space<vmem>>, %arg6: memref<1x1x16xf32, #tpu.memory_space<vmem>>, %arg7: memref<1x16x128xf32, #tpu.memory_space<vmem>>) attributes {dimension_semantics = [#tpu.dimension_semantics<parallel>, #tpu.dimension_semantics<parallel>], iteration_bounds = array<i64: 2, 2>, scalar_prefetch = 0 : i64, scratch_operands = 0 : i64, tpu.core_type = #tpu.core_type<tc>, window_params = [{transform_indices = @transform_0, window_bounds = array<i64: 1, 16, 256>}, {transform_indices = @transform_1, window_bounds = array<i64: 128, 256>}, {transform_indices = @transform_2, window_bounds = array<i64: 128, 256>}, {transform_indices = @transform_3, window_bounds = array<i64: 128, 256>}, {transform_indices = @transform_4, window_bounds = array<i64: 1, 1, 16>}, {transform_indices = @transform_5, window_bounds = array<i64: 1, 16, 128>}]} {
    %c0 = arith.constant 0 : index
    %c0_0 = arith.constant 0 : index
    %c0_1 = arith.constant 0 : index
    %0 = vector.load %arg2[%c0, %c0_0, %c0_1] : memref<1x16x256xf32, #tpu.memory_space<vmem>>, vector<1x16x256xf32>
    %1 = vector.shape_cast %0 : vector<1x16x256xf32> to vector<16x256xf32>
    %c0_2 = arith.constant 0 : index
    %c0_3 = arith.constant 0 : index
    %2 = vector.load %arg3[%c0_2, %c0_3] : memref<128x256xf32, #tpu.memory_space<vmem>>, vector<128x256xf32>
    %cst = arith.constant dense<0.000000e+00> : vector<16x128xf32>
    %3 = tpu.matmul %1, %2, %cst {dimension_numbers = #tpu.dot_dimension_numbers<[1], [1], [0], [0], [0, 0, 1, 0], [], []>} : vector<16x256xf32>, vector<128x256xf32>, vector<16x128xf32> -> vector<16x128xf32>
    %c0_4 = arith.constant 0 : index
    %c0_5 = arith.constant 0 : index
    %4 = vector.load %arg4[%c0_4, %c0_5] : memref<128x256xf32, #tpu.memory_space<vmem>>, vector<128x256xf32>
    %cst_6 = arith.constant dense<0.000000e+00> : vector<16x128xf32>
    %5 = tpu.matmul %1, %4, %cst_6 {dimension_numbers = #tpu.dot_dimension_numbers<[1], [1], [0], [0], [0, 0, 1, 0], [], []>} : vector<16x256xf32>, vector<128x256xf32>, vector<16x128xf32> -> vector<16x128xf32>
    %c0_7 = arith.constant 0 : index
    %c0_8 = arith.constant 0 : index
    %6 = vector.load %arg5[%c0_7, %c0_8] : memref<128x256xf32, #tpu.memory_space<vmem>>, vector<128x256xf32>
    %cst_9 = arith.constant dense<0.000000e+00> : vector<16x128xf32>
    %7 = tpu.matmul %1, %6, %cst_9 {dimension_numbers = #tpu.dot_dimension_numbers<[1], [1], [0], [0], [0, 0, 1, 0], [], []>} : vector<16x256xf32>, vector<128x256xf32>, vector<16x128xf32> -> vector<16x128xf32>
    %cst_10 = arith.constant 1.250000e-01 : f32
    %8 = vector.broadcast %cst_10 : f32 to vector<16x128xf32>
    %9 = arith.mulf %3, %8 : vector<16x128xf32>
    %c0_11 = arith.constant 0 : index
    %c0_12 = arith.constant 0 : index
    %c0_13 = arith.constant 0 : index
    %10 = vector.load %arg6[%c0_11, %c0_12, %c0_13] : memref<1x1x16xf32, #tpu.memory_space<vmem>>, vector<1x1x16xf32>
    %11 = vector.shape_cast %10 : vector<1x1x16xf32> to vector<1x16xf32>
    %12 = vector.extract_strided_slice %9 {offsets = [0, 0], sizes = [16, 64], strides = [1, 1]} : vector<16x128xf32> to vector<16x64xf32>
    %13 = vector.extract_strided_slice %5 {offsets = [0, 0], sizes = [16, 64], strides = [1, 1]} : vector<16x128xf32> to vector<16x64xf32>
    %cst_14 = arith.constant dense<0.000000e+00> : vector<16x16xf32>
    %14 = tpu.matmul %12, %13, %cst_14 {dimension_numbers = #tpu.dot_dimension_numbers<[1], [1], [0], [0], [0, 0, 1, 0], [], []>} : vector<16x64xf32>, vector<16x64xf32>, vector<16x16xf32> -> vector<16x16xf32>
    %15 = vector.broadcast %11 : vector<1x16xf32> to vector<16x16xf32>
    %16 = arith.addf %14, %15 : vector<16x16xf32>
    %cst_15 = arith.constant dense<0xFF800000> : vector<16xf32>
    %17 = vector.multi_reduction <maximumf>, %16, %cst_15 [1] : vector<16x16xf32> to vector<16xf32>
    %18 = vector.shape_cast %17 : vector<16xf32> to vector<16x1xf32>
    %19 = vector.broadcast %18 : vector<16x1xf32> to vector<16x16xf32>
    %20 = arith.subf %16, %19 : vector<16x16xf32>
    %21 = math.exp %20 : vector<16x16xf32>
    %cst_16 = arith.constant dense<0.000000e+00> : vector<16xf32>
    %22 = vector.multi_reduction <add>, %21, %cst_16 [1] : vector<16x16xf32> to vector<16xf32>
    %23 = vector.shape_cast %22 : vector<16xf32> to vector<16x1xf32>
    %24 = vector.extract_strided_slice %7 {offsets = [0, 0], sizes = [16, 64], strides = [1, 1]} : vector<16x128xf32> to vector<16x64xf32>
    %cst_17 = arith.constant dense<0.000000e+00> : vector<16x64xf32>
    %25 = tpu.matmul %21, %24, %cst_17 {dimension_numbers = #tpu.dot_dimension_numbers<[1], [0], [0], [1], [0, 0, 1, 1], [], []>} : vector<16x16xf32>, vector<16x64xf32>, vector<16x64xf32> -> vector<16x64xf32>
    %26 = tpu.reciprocal %23 {approx = true} : vector<16x1xf32> -> vector<16x1xf32>
    %27 = vector.broadcast %26 : vector<16x1xf32> to vector<16x64xf32>
    %28 = arith.mulf %25, %27 : vector<16x64xf32>
    %29 = vector.extract_strided_slice %9 {offsets = [0, 64], sizes = [16, 64], strides = [1, 1]} : vector<16x128xf32> to vector<16x64xf32>
    %30 = vector.extract_strided_slice %5 {offsets = [0, 64], sizes = [16, 64], strides = [1, 1]} : vector<16x128xf32> to vector<16x64xf32>
    %cst_18 = arith.constant dense<0.000000e+00> : vector<16x16xf32>
    %31 = tpu.matmul %29, %30, %cst_18 {dimension_numbers = #tpu.dot_dimension_numbers<[1], [1], [0], [0], [0, 0, 1, 0], [], []>} : vector<16x64xf32>, vector<16x64xf32>, vector<16x16xf32> -> vector<16x16xf32>
    %32 = vector.broadcast %11 : vector<1x16xf32> to vector<16x16xf32>
    %33 = arith.addf %31, %32 : vector<16x16xf32>
    %cst_19 = arith.constant dense<0xFF800000> : vector<16xf32>
    %34 = vector.multi_reduction <maximumf>, %33, %cst_19 [1] : vector<16x16xf32> to vector<16xf32>
    %35 = vector.shape_cast %34 : vector<16xf32> to vector<16x1xf32>
    %36 = vector.broadcast %35 : vector<16x1xf32> to vector<16x16xf32>
    %37 = arith.subf %33, %36 : vector<16x16xf32>
    %38 = math.exp %37 : vector<16x16xf32>
    %cst_20 = arith.constant dense<0.000000e+00> : vector<16xf32>
    %39 = vector.multi_reduction <add>, %38, %cst_20 [1] : vector<16x16xf32> to vector<16xf32>
    %40 = vector.shape_cast %39 : vector<16xf32> to vector<16x1xf32>
    %41 = vector.extract_strided_slice %7 {offsets = [0, 64], sizes = [16, 64], strides = [1, 1]} : vector<16x128xf32> to vector<16x64xf32>
    %cst_21 = arith.constant dense<0.000000e+00> : vector<16x64xf32>
    %42 = tpu.matmul %38, %41, %cst_21 {dimension_numbers = #tpu.dot_dimension_numbers<[1], [0], [0], [1], [0, 0, 1, 1], [], []>} : vector<16x16xf32>, vector<16x64xf32>, vector<16x64xf32> -> vector<16x64xf32>
    %43 = tpu.reciprocal %40 {approx = true} : vector<16x1xf32> -> vector<16x1xf32>
    %44 = vector.broadcast %43 : vector<16x1xf32> to vector<16x64xf32>
    %45 = arith.mulf %42, %44 : vector<16x64xf32>
    %46 = tpu.concatenate %28, %45 in 1 : vector<16x64xf32>, vector<16x64xf32> -> vector<16x128xf32>
    %c0_22 = arith.constant 0 : index
    %c0_23 = arith.constant 0 : index
    %c0_24 = arith.constant 0 : index
    %47 = vector.load %arg7[%c0_22, %c0_23, %c0_24] : memref<1x16x128xf32, #tpu.memory_space<vmem>>, vector<1x16x128xf32>
    %48 = vector.shape_cast %47 : vector<1x16x128xf32> to vector<16x128xf32>
    %49 = vector.shape_cast %46 : vector<16x128xf32> to vector<1x16x128xf32>
    tpu.vector_store %arg7[%c0_22, %c0_23, %c0_24], %49 {strides = array<i32>} : memref<1x16x128xf32, #tpu.memory_space<vmem>>, vector<1x16x128xf32>,
    return
  }
  func.func @transform_0(%arg0: i32, %arg1: i32) -> (i32, i32, i32) {
    %c0_i32 = arith.constant 0 : i32
    %c0_i32_0 = arith.constant 0 : i32
    %c0_i32_1 = arith.constant 0 : i32
    return %arg0, %c0_i32, %c0_i32_0 : i32, i32, i32
  }
  func.func @transform_1(%arg0: i32, %arg1: i32) -> (i32, i32) {
    %c0_i32 = arith.constant 0 : i32
    %c0_i32_0 = arith.constant 0 : i32
    return %arg1, %c0_i32 : i32, i32
  }
  func.func @transform_2(%arg0: i32, %arg1: i32) -> (i32, i32) {
    %c0_i32 = arith.constant 0 : i32
    %c0_i32_0 = arith.constant 0 : i32
    return %arg1, %c0_i32 : i32, i32
  }
  func.func @transform_3(%arg0: i32, %arg1: i32) -> (i32, i32) {
    %c0_i32 = arith.constant 0 : i32
    %c0_i32_0 = arith.constant 0 : i32
    return %arg1, %c0_i32 : i32, i32
  }
  func.func @transform_4(%arg0: i32, %arg1: i32) -> (i32, i32, i32) {
    %c0_i32 = arith.constant 0 : i32
    %c0_i32_0 = arith.constant 0 : i32
    %c0_i32_1 = arith.constant 0 : i32
    return %arg0, %c0_i32, %c0_i32_0 : i32, i32, i32
  }
  func.func @transform_5(%arg0: i32, %arg1: i32) -> (i32, i32, i32) {
    %c0_i32 = arith.constant 0 : i32
    %c0_i32_0 = arith.constant 0 : i32
    return %arg0, %c0_i32, %arg1 : i32, i32, i32
  }
}

</mosaic_0001>

<bundles_post_ra>
// kernel: tpu_custom_call.1
= control target key start
LH: loop header
LB: loop body
LE: loop exit
PB: predicated region body
PF: predicated region fallthrough
CT: control target
= control target key end

     0   :  { %s2624_s0 = inlined_call_operand.hbm [shape: f32[2,16,256], index: 0, kind: input, shape index: {}]   ;;  %s2625_s1 = inlined_call_operand.hbm [shape: f32[256,256], index: 1, kind: input, shape index: {}]   ;;  %s2626_s2 = inlined_call_operand.hbm [shape: f32[256,256], index: 2, kind: input, shape index: {}]   ;;  %s2627_s3 = inlined_call_operand.hbm [shape: f32[256,256], index: 3, kind: input, shape index: {}]   ;;  %s2628_s4 = inlined_call_operand.vmem [shape: f32[2,1,16], index: 4, kind: input, shape index: {}]   ;;  %s2629_s5 = inlined_call_operand.hbm [shape: f32[2,16,256], index: 5, kind: output, shape index: {}]  }
   0x1   :  { %2655 = sst [smem:[#allocation29_spill]] %s2625_s1 }
   0x2   :  { %2656 = sst [smem:[#allocation30_spill]] %s2628_s4 }
   0x3   :  { %2657 = sst [smem:[#allocation31_spill]] %s2629_s5 }
   0x4   :  { %10 = vsyncpa [#allocation3], 0 }
   0x5   :  { %12 = vsyncpa [#allocation3 + $0x1], 0 }
   0x6   :  { %13 = vsyncpa [#allocation6], 0 }
   0x7   :  { %15 = vsyncpa [#allocation6 + $0x1], 0 }
   0x8   :  { %16 = vsyncpa [#allocation9], 0 }
   0x9   :  { %18 = vsyncpa [#allocation9 + $0x1], 0 }
   0xa   :  { %19 = vsyncpa [#allocation4], 0 }
   0xb   :  { %21 = vsyncpa [#allocation4 + $0x1], 0  ;;  %s2010_s18 = smov 0   ;;  %s2012_s19 = smov 0  }
   0xc   :  { %s2014_s20 = smov 0   ;;  %s2016_s21 = smov 0  }
   0xd   :  { %s2018_s22 = smov 0   ;;  %s2020_s23 = smov 0  }
   0xe   :  { %s2022_s24 = smov 0   ;;  %s2024_s25 = smov 0  }
   0xf   :  { %s2026_s26 = smov 0   ;;  %s2028_s27 = smov 0  }
  0x10   :  { %s2030_s28 = smov 0   ;;  %s2032_s29 = smov 0  }
  0x11   :  { %s2034_s30 = smov 0   ;;  %s2036_s6 = smov 0  }
  0x12 LB: > { %2658 = sst [smem:[#allocation15_spill]] %s1923_s20  ;;  %s36_s7 = sadd.s32 1, %s1959_s29  ;;  %s1967_s6 = sphi %s2036_s6, %s27_s6   ;;  %s1963_s30 = sphi %s2034_s30, %s2717_s30   ;;  %s1959_s29 = sphi %s2032_s29, %s2716_s29   ;;  %s1955_s28 = sphi %s2030_s28, %s2715_s28   ;;  %s1951_s27 = sphi %s2028_s27, %s2724_s27   ;;  %s1947_s26 = sphi %s2026_s26, %s2713_s26   ;;  %s1943_s25 = sphi %s2024_s25, %s2712_s25   ;;  %s1939_s24 = sphi %s2022_s24, %s2711_s24   ;;  %s1935_s23 = sphi %s2020_s23, %s2723_s23   ;;  %s1931_s22 = sphi %s2018_s22, %s2722_s22   ;;  %s1927_s21 = sphi %s2016_s21, %s2721_s21   ;;  %s1923_s20 = sphi %s2014_s20, %s2709_s20   ;;  %s1919_s19 = sphi %s2012_s19, %s2720_s19   ;;  %s1915_s18 = sphi %s2010_s18, %s2719_s18  }
  0x13   : > { %2659 = sst [smem:[#allocation16_spill]] %s1943_s25  ;;  %p2636_p0 = scmp.eq.s32.totalorder %s1967_s6, 0 }
  0x14   : > { %2660 = sst [smem:[#allocation17_spill]] %s1947_s26  ;;  %p2082_p1 = scmp.ge.s32.totalorder %s36_s7, 2 }
  0x15   : > { %2661 = sst [smem:[#allocation18_spill]] %s1951_s27  ;;  %s72_s9 = sadd.s32 1, %s1935_s23 }
  0x16   : > { %2662 = sst [smem:[#allocation19_spill]] %s1955_s28  ;;  %p79_p2 = scmp.ne.s32.totalorder %s1935_s23, %s1931_s22 }
  0x17   : > { %2663 = sst [smem:[#allocation20_spill]] %s1959_s29  ;;  %s2726_s7 = smov (%p2082_p1, %s36_s7), 0 }
  0x18   : > { %2664 = sst [smem:[#allocation21_spill]] %s1963_s30  ;;  %p81_p4 = por %p79_p2, %p2636_p0 }
  0x19   : > { %s2665_s8 = scalar_select %p2082_p1, 1, 0 }
  0x1a   : > { %2666 = sst [smem:[#allocation22_spill]] %s2726_s7  ;;  %s2099_s10 = ssub.s32 %s1959_s29, %s2726_s7 }
  0x1b   : > { %p2635_p5 = scmp.lt.s32.totalorder %s1967_s6, 4  ;;  %p70_p6 = scmp.eq.s32.totalorder %s2099_s10, 0 }
  0x1c   : > { %s236_s11 = sand.u32 1, %s1967_s6   ;;  %s2632_s13 = sand.u32 1, %s1935_s23  }
  0x1d   : > { %s2105_s12 = scalar_select %p70_p6, %s1935_s23, %s72_s9  }
  0x1e   : > { %s2110_s14 = sshll.u32 %s2632_s13, 8  ;;  %s2113_s15 = sshll.u32 %s1959_s29, 12 }
  0x1f   : > { %2667 = sst [smem:[#allocation23_spill]] %s2105_s12  ;;  %s2668_s1 = sld [smem:[#allocation29_spill]] }
  0x20   : > { %s240_s7 = scalar_lea.vmem [#allocation5], %s2110_s14  ;;  %p2124_p7 = pnand %p2635_p5, %p81_p4 }
  0x21   : > { %s248_s9 = sshll.u32 %s240_s7, 4  ;;  %s2132_s13 = scalar_lea.sflag [#allocation6], %s236_s11  ;;  %s2128_s9 = int_to_ptr.vmem [resolvable:$true] %s248_s9 }
  0x22   : > { %s2669_s12 = scalar_select %p2124_p7, 1, 0 }
  0x23   : > { %p2138_p11 = pneg %p2124_p7 }
  0x25   : > { %s2119_s5 = scalar_lea.hbm %s2668_s1, %s2113_s15  ;;  %s1698_s27 = scalar_lea.hbm %s2668_s1, 8192 }
  0x26   : > { %s1693_s16 = scalar_lea.hbm %s2119_s5, 4096  ;;  %p1699_p2 = scmp.lt.u32.totalorder %s2119_s5, %s2668_s1 }
  0x27   : > { %p1694_p10 = scmp.ne.s32.totalorder %s2119_s5, %s1693_s16  ;;  %p1700_p4 = scmp.lt.u32.totalorder %s1698_s27, %s1693_s16 }
  0x28   : > { %p1702_p5 = scmp.lt.u32.totalorder %s1693_s16, %s2119_s5 }
  0x29   : > { %p1696_p12 = pnand %p2138_p11, %p1694_p10  ;;  %p1701_p6 = por %p1700_p4, %p1699_p2 }
  0x2b   : > { %p1697_p13 = pneg %p1696_p12  ;;  %p1703_p3 = por %p1702_p5, %p1701_p6 }
  0x2d   : > { %p1704_p0 = pnand %p1703_p3, %p1697_p13 }
  0x2f   : > { %1707 = shalt.err (!%p1704_p0)
}
  0x30   : > { %s1708_s11 = scalar_lea.vmem %s2128_s9, 4096  ;;  %s1969_s29 = smov [#allocation5]  }
  0x31   : > { %p1709_p10 = scmp.ne.s32.totalorder %s2128_s9, %s1708_s11  ;;  %s1713_s7 = sshll.u32 %s1969_s29, 4  ;;  %s1714_s7 = int_to_ptr.vmem [resolvable:$false] %s1713_s7 }
  0x32   : > { %s1715_s4 = scalar_lea.vmem %s1714_s7, 8192  ;;  %p1716_p9 = scmp.lt.s32.totalorder %s2128_s9, %s1714_s7 }
  0x33   : > { %p1711_p12 = pnand %p1709_p10, %p2138_p11  ;;  %p1717_p1 = scmp.lt.s32.totalorder %s1715_s4, %s1708_s11 }
  0x35   : > { %p1712_p8 = pneg %p1711_p12  ;;  %p1718_p2 = por %p1717_p1, %p1716_p9 }
  0x37   : > { %p1719_p4 = pnand %p1718_p2, %p1712_p8 }
  0x39   : > { %1722 = shalt.err (!%p1719_p4)
}
  0x3a   : > { %s2638_s27 = smov 256   ;;  %s2640_s28 = smov 16  }
  0x3b   : > { %1536 = dma.hbm_to_vmem [thread:$0]  (!%p2124_p7), %s2119_s5, 4096, %s2128_s9, %s2132_s13, %s2638_s27, %s2638_s27, %s2640_s28  }
  0x3c   : > { %p2671_p0 = scmp.lt.s32.totalorder %s1967_s6, 5  ;;  %p2672_p1 = scmp.ge.s32.totalorder %s1967_s6, 1 }
  0x3d   : > { %s2174_s11 = sadd.s32 4294967295, %s1967_s6   ;;  %s1311_s29 = sadd.s32 4294967294, %s1967_s6  }
  0x3e   : > { %p2169_p3 = pnand %p2672_p1, %p2671_p0  ;;  %s39_s7 = sadd.s32 1, %s1963_s30 }
  0x3f   : > { %p2674_p5 = scmp.ne.s32.totalorder %s2665_s8, 0  ;;  %s46_s4 = sadd.s32 1, %s1947_s26 }
  0x40   : > { %s2673_s16 = scalar_select %p2169_p3, 1, 0 }
  0x41   : > { %s2728_s7 = smov (!%p2674_p5, %s39_s7), %s1963_s30  ;;  %p53_p8 = scmp.ne.s32.totalorder %s1947_s26, %s1943_s25 }
  0x42   : > { %p41_p9 = scmp.ge.s32.totalorder %s2728_s7, 2  ;;  %p59_p13 = scmp.ne.s32.totalorder %s1943_s25, %s1939_s24 }
  0x43   : > { %p2675_p6 = scmp.eq.s32.totalorder %s1967_s6, 0  ;;  %p60_p12 = scmp.eq.s32.totalorder %s2174_s11, 0 }
  0x44   : > { %s2730_s7 = smov (%p41_p9, %s2728_s7), 0  ;;  %p2679_p4 = scmp.ne.s32.totalorder %s1931_s22, %s1927_s21 }
  0x45   : > { %p2188_p10 = por %p2675_p6, %p53_p8  ;;  %2677 = sst [smem:[#allocation24_spill]] %s2730_s7 }
  0x46   : > { %p2195_p2 = por %p60_p12, %p59_p13  ;;  %p2202_p0 = por %p2679_p4, %p60_p12 }
  0x47   : > { %s43_s24 = ssub.s32 %s1963_s30, %s2730_s7  ;;  %s178_s27 = sadd.s32 1, %s1923_s20 }
  0x48   : > { %s2678_s8 = scalar_select %p2195_p2, 1, 0 }
  0x49   : > { %s2680_s9 = scalar_select %p2202_p0, 1, 0 }
  0x4a   : > { %p44_p1 = scmp.eq.s32.totalorder %s43_s24, 0  ;;  %s175_s28 = sor.u32 %s2099_s10, %s43_s24 }
  0x4b   : > { %2681 = sst [smem:[#allocation25_spill]] %s2680_s9  ;;  %p176_p5 = scmp.eq.s32.totalorder %s175_s28, 0 }
  0x4c   : > { %p188_p8 = scmp.ne.s32.totalorder %s1923_s20, %s1919_s19  ;;  %p189_p9 = scmp.eq.s32.totalorder %s2174_s11, 3 }
  0x4d   : > { %s2213_s1 = scalar_select %p44_p1, %s1947_s26, %s46_s4  }
  0x4e   : > { %s2216_s25 = scalar_select %p176_p5, %s1923_s20, %s178_s27  }
  0x4f   : > { %2682 = sst [smem:[#allocation26_spill]] %s2213_s1  ;;  %p194_p13 = scmp.ne.s32.totalorder %s1919_s19, %s1915_s18 }
  0x50   : > { %2683 = sst [smem:[#allocation27_spill]] %s2216_s25  ;;  %p195_p6 = scmp.eq.s32.totalorder %s1311_s29, 3 }
  0x51   : > { %s215_s21 = sand.u32 1, %s1947_s26   ;;  %p2222_p12 = por %p189_p9, %p188_p8 }
  0x52   : > { %p2226_p4 = por %p195_p6, %p194_p13  ;;  %s1314_s28 = sshll.u32 %s215_s21, 5 }
  0x53   : > { %s2684_s9 = scalar_select %p2222_p12, 1, 0 }
  0x54   : > { %s2685_s10 = scalar_select %p2226_p4, 1, 0 }
  0x55   : > { %s1353_s24 = sshll.u32 %s1963_s30, 9  ;;  %s219_s27 = scalar_lea.vmem [#allocation2], %s1314_s28 }
  0x56   : > { %2686 = sst [smem:[#allocation28_spill]] %s2685_s10  ;;  %s2234_s1 = scalar_lea.hbm %s2624_s0, %s1353_s24 }
  0x57   : > { %s226_s29 = sshll.u32 %s219_s27, 4  ;;  %p2687_p1 = scmp.lt.s32.totalorder %s1967_s6, 4  ;;  %s2236_s29 = int_to_ptr.vmem [resolvable:$true] %s226_s29 }
  0x58   : > { %s2250_s7 = scalar_lea.hbm %s2626_s2, %s2113_s15  ;;  %s262_s24 = scalar_lea.vmem [#allocation7], %s2110_s14 }
  0x59   : > { %p2242_p5 = pnand %p2687_p1, %p2188_p10  ;;  %s2253_s4 = sshll.u32 %s262_s24, 4  ;;  %s2287_s4 = int_to_ptr.vmem [resolvable:$true] %s2253_s4 }
  0x5a   : > { %s2255_s28 = scalar_lea.sflag [#allocation3], %s215_s21  ;;  %s1723_s27 = scalar_lea.hbm %s2234_s1, 512 }
  0x5b   : > { %p1724_p8 = scmp.ne.s32.totalorder %s2234_s1, %s1723_s27  ;;  %p1725_p9 = pneg %p2242_p5 }
  0x5c   : > { %s1728_s25 = scalar_lea.hbm %s2624_s0, 1024  ;;  %p1729_p6 = scmp.lt.u32.totalorder %s2234_s1, %s2624_s0 }
  0x5d   : > { %p1726_p10 = pnand %p1725_p9, %p1724_p8  ;;  %p1730_p1 = scmp.lt.u32.totalorder %s1728_s25, %s1723_s27 }
  0x5e   : > { %p1732_p12 = scmp.lt.u32.totalorder %s1723_s27, %s2234_s1 }
  0x5f   : > { %p1727_p13 = pneg %p1726_p10  ;;  %p1731_p4 = por %p1730_p1, %p1729_p6 }
  0x61   : > { %p1733_p0 = por %p1732_p12, %p1731_p4 }
  0x63   : > { %p1734_p2 = pnand %p1733_p0, %p1727_p13 }
  0x65   : > { %1737 = shalt.err (!%p1734_p2)
}
  0x66   : > { %s1738_s21 = scalar_lea.vmem %s2236_s29, 512  ;;  %s1972_s20 = smov [#allocation2]  }
  0x67   : > { %p1739_p8 = scmp.ne.s32.totalorder %s2236_s29, %s1738_s21  ;;  %s1743_s24 = sshll.u32 %s1972_s20, 4  ;;  %s1744_s24 = int_to_ptr.vmem [resolvable:$false] %s1743_s24 }
  0x68   : > { %s1745_s10 = scalar_lea.vmem %s1744_s24, 1024  ;;  %p1746_p7 = scmp.lt.s32.totalorder %s2236_s29, %s1744_s24 }
  0x69   : > { %p1741_p10 = pnand %p1739_p8, %p1725_p9  ;;  %p1747_p6 = scmp.lt.s32.totalorder %s1745_s10, %s1738_s21 }
  0x6b   : > { %p1742_p3 = pneg %p1741_p10  ;;  %p1748_p1 = por %p1747_p6, %p1746_p7 }
  0x6d   : > { %p1749_p12 = pnand %p1748_p1, %p1742_p3 }
  0x6f   : > { %1752 = shalt.err (!%p1749_p12)
}
  0x70   : > { %s2689_s27 = smov 16   ;;  %s2690_s5 = smov 256  }
  0x71   : > { %1533 = dma.hbm_to_vmem [thread:$0]  (!%p2242_p5), %s2234_s1, 512, %s2236_s29, %s2255_s28, %s2690_s5, %s2690_s5, %s2689_s27  }
  0x72   : > { %s1753_s25 = scalar_lea.hbm %s2250_s7, 4096  ;;  %s1758_s21 = scalar_lea.hbm %s2626_s2, 8192 }
  0x73   : > { %p1754_p7 = scmp.ne.s32.totalorder %s2250_s7, %s1753_s25  ;;  %p1759_p0 = scmp.lt.u32.totalorder %s2250_s7, %s2626_s2 }
  0x74   : > { %p1760_p4 = scmp.lt.u32.totalorder %s1758_s21, %s1753_s25  ;;  %p1762_p13 = scmp.lt.u32.totalorder %s1753_s25, %s2250_s7 }
  0x75   : > { %p1756_p3 = pnand %p1754_p7, %p2138_p11 }
  0x76   : > { %p1761_p9 = por %p1760_p4, %p1759_p0 }
  0x77   : > { %p1757_p2 = pneg %p1756_p3 }
  0x78   : > { %p1763_p8 = por %p1762_p13, %p1761_p9 }
  0x7a   : > { %p1764_p5 = pnand %p1763_p8, %p1757_p2 }
  0x7c   : > { %1767 = shalt.err (!%p1764_p5)
}
  0x7d   : > { %s1768_s1 = scalar_lea.vmem %s2287_s4, 4096  ;;  %s1973_s29 = smov [#allocation7]  }
  0x7e   : > { %p1769_p10 = scmp.ne.s32.totalorder %s2287_s4, %s1768_s1  ;;  %s1773_s28 = sshll.u32 %s1973_s29, 4  ;;  %s1774_s28 = int_to_ptr.vmem [resolvable:$false] %s1773_s28 }
  0x7f   : > { %s1775_s10 = scalar_lea.vmem %s1774_s28, 8192  ;;  %p1776_p12 = scmp.lt.s32.totalorder %s2287_s4, %s1774_s28 }
  0x80   : > { %p1771_p6 = pnand %p1769_p10, %p2138_p11  ;;  %p1777_p7 = scmp.lt.s32.totalorder %s1775_s10, %s1768_s1 }
  0x82   : > { %p1772_p1 = pneg %p1771_p6  ;;  %p1778_p3 = por %p1777_p7, %p1776_p12 }
  0x84   : > { %p1779_p0 = pnand %p1778_p3, %p1772_p1 }
  0x86   : > { %1782 = shalt.err (!%p1779_p0)
}
  0x87   : > { %p2691_p2 = scmp.ne.s32.totalorder %s2669_s12, 0  ;;  %s2318_s30 = scalar_lea.hbm %s2627_s3, %s2113_s15 }
  0x88   : > { %s284_s21 = scalar_lea.vmem [#allocation8], %s2110_s14  ;;  %s2692_s24 = sand.u32 1, %s1935_s23  }
  0x89   : > { %1539 = dma.hbm_to_vmem [thread:$0]  (!%p2691_p2), %s2250_s7, 4096, %s2287_s4, %s2132_s13, %s2690_s5, %s2690_s5, %s2689_s27  }
  0x8a   : > { %s292_s20 = sshll.u32 %s284_s21, 4  ;;  %s2325_s1 = scalar_lea.sflag [#allocation9], %s2692_s24  ;;  %s2321_s20 = int_to_ptr.vmem [resolvable:$true] %s292_s20 }
  0x8b   : > { %s1783_s29 = scalar_lea.hbm %s2318_s30, 4096  ;;  %s1788_s15 = scalar_lea.hbm %s2627_s3, 8192 }
  0x8c   : > { %p1784_p4 = scmp.ne.s32.totalorder %s2318_s30, %s1783_s29  ;;  %p1789_p8 = scmp.lt.u32.totalorder %s2318_s30, %s2627_s3 }
  0x8d   : > { %p1790_p5 = scmp.lt.u32.totalorder %s1788_s15, %s1783_s29  ;;  %p1792_p6 = scmp.lt.u32.totalorder %s1783_s29, %s2318_s30 }
  0x8e   : > { %p1786_p9 = pnand %p1784_p4, %p2138_p11 }
  0x8f   : > { %p1791_p10 = por %p1790_p5, %p1789_p8 }
  0x90   : > { %p1787_p13 = pneg %p1786_p9 }
  0x91   : > { %p1793_p1 = por %p1792_p6, %p1791_p10 }
  0x93   : > { %p1794_p12 = pnand %p1793_p1, %p1787_p13 }
  0x95   : > { %1797 = shalt.err (!%p1794_p12)
}
  0x96   : > { %s1798_s14 = scalar_lea.vmem %s2321_s20, 4096  ;;  %s1974_s10 = smov [#allocation8]  }
  0x97   : > { %p1799_p7 = scmp.ne.s32.totalorder %s2321_s20, %s1798_s14  ;;  %s1803_s25 = sshll.u32 %s1974_s10, 4  ;;  %s1804_s25 = int_to_ptr.vmem [resolvable:$false] %s1803_s25 }
  0x98   : > { %s1805_s26 = scalar_lea.vmem %s1804_s25, 8192  ;;  %p1806_p4 = scmp.lt.s32.totalorder %s2321_s20, %s1804_s25 }
  0x99   : > { %p1801_p3 = pnand %p1799_p7, %p2138_p11  ;;  %p1807_p9 = scmp.lt.s32.totalorder %s1805_s26, %s1798_s14 }
  0x9b   : > { %p1802_p0 = pneg %p1801_p3  ;;  %p1808_p8 = por %p1807_p9, %p1806_p4 }
  0x9d   : > { %p1809_p5 = pnand %p1808_p8, %p1802_p0 }
  0x9f   : > { %1812 = shalt.err (!%p1809_p5)
}
  0xa0   : > { %1542 = dma.hbm_to_vmem [thread:$0]  (!%p2691_p2), %s2318_s30, 4096, %s2321_s20, %s2325_s1, %s2690_s5, %s2690_s5, %s2689_s27  }
  0xa1   : > { %p2693_p11 = scmp.ne.s32.totalorder %s2673_s16, 0 }
  0xa2   : > { %s2694_s17 = sld [smem:[#allocation16_spill]] (!%p2693_p11)  ;;  %p2695_p13 = scmp.ne.s32.totalorder (!%p2693_p11), %s2678_s8, 0 }
  0xa3   : > { %310 = sbr.rel (%p2693_p11) target bundleno = 1587 (0x633), region = 40 }
  0xa8   : > { %s312_s21 = sand.u32 (!%p2693_p11), 1, %s2694_s17  }
  0xa9   : > { %s1330_s24 = sshll.u32 (!%p2693_p11), %s312_s21, 5  ;;  %s313_s29 = scalar_lea.sflag (!%p2693_p11), [#allocation3], %s312_s21 }
  0xaa   : > { %s2355_s13 = scalar_lea.vmem [#allocation2], %s1330_s24 }
  0xab   : > { %1898 = dma.done.wait (%p2695_p13), %s313_s29, 512  }
  0xac   : > { %1900 = vsyncadd (%p2695_p13), %s313_s29, 4294966784  ;;  %s2696_s12 = sld [smem:[#allocation25_spill]]  ;;  %s321_s7 = sand.u32 1, %s2174_s11  }
  0xad   : > { %s323_s27 = sand.u32 1, %s1931_s22   ;;  %s322_s16 = scalar_lea.sflag [#allocation6], %s321_s7 }
  0xae   : > { %s1331_s5 = sshll.u32 %s323_s27, 8 }
  0xaf   : > { %s2363_s30 = scalar_lea.vmem [#allocation5], %s1331_s5 }
  0xb2   : > { %p2697_p2 = scmp.ne.s32.totalorder %s2696_s12, 0 }
  0xb4   : > { %1902 = dma.done.wait (%p2697_p2), %s322_s16, 8192  }
  0xb5   : > { %1904 = vsyncadd (%p2697_p2), %s322_s16, 4294959104  ;;  %s2369_s20 = scalar_lea.vmem [#allocation7], %s1331_s5  ;;  %s340_s1 = scalar_lea.sflag [#allocation9], %s323_s27 }
  0xb6   : > { %s2371_s8 = scalar_lea.vmem [#allocation8], %s1331_s5 }
  0xb7   : > { %1906 = dma.done.wait (%p2697_p2), %s340_s1, 4096  }
  0xb8   : > { %1908 = vsyncadd (%p2697_p2), %s340_s1, 4294963200  ;;  %v506_v0 = vld [vmem:[%s2369_s20 + $0x8] sm:$0xff]  ;;  %v508_v1 = vld [vmem:[%s2369_s20 + $0x18] sm:$0xff]  ;;  %vm728_vm0 = vcmask 523264   ;;  %s1975_s11 = smov 64   ;;  %s2700_s15 = sld [smem:[#allocation19_spill]] }
  0xb9   : > { %v505_v2 = vld [vmem:[%s2369_s20] sm:$0xff]  ;;  %v1436_v3 = vpack.c.bf16 %v508_v1, %v506_v0  ;;  %v507_v4 = vld [vmem:[%s2369_s20 + $0x10] sm:$0xff]  ;;  %v399_v5 = vld [vmem:[%s2363_s30 + $0x8] sm:$0xff]  ;;  %s2701_s10 = sld [smem:[#allocation30_spill]]  ;;  %vm816_vm2 = vcmask 130048   ;;  %s2702_s26 = sld [smem:[#allocation18_spill]] }
  0xba   : > { %v401_v6 = vld [vmem:[%s2363_s30 + $0x18] sm:$0xff]  ;;  %v1438_v7 = vpack.c.bf16 %v507_v4, %v505_v2  ;;  %v510_v9 = vld [vmem:[%s2369_s20 + $0x28] sm:$0xff]  ;;  %v398_v11 = vld [vmem:[%s2363_s30] sm:$0xff]  ;;  %s385_s17 = sand.u32 1, %s1919_s19   ;;  %s2703_s16 = sld [smem:[#allocation31_spill]] }
  0xbb   : > { %v1404_v8 = vpack.c.bf16 %v401_v6, %v399_v5  ;;  %v512_v10 = vld [vmem:[%s2369_s20 + $0x38] sm:$0xff]  ;;  %1437 = vmatprep.subr.bf16.mxu1 %v1436_v3  ;;  %v400_v13 = vld [vmem:[%s2363_s30 + $0x10] sm:$0xff]  ;;  %v403_v15 = vld [vmem:[%s2363_s30 + $0x28] sm:$0xff]  ;;  %s1334_s24 = sshll.u32 %s385_s17, 4  ;;  %p2704_p1 = scmp.ne.s32.totalorder %s2684_s9, 0 }
  0xbc   : > { %v1440_v12 = vpack.c.bf16 %v512_v10, %v510_v9  ;;  %1439 = vmatpush1.bf16.xpose.msra.mxu1 %v1438_v7  ;;  %v1406_v14 = vpack.c.bf16 %v400_v13, %v398_v11  ;;  %v405_v16 = vld [vmem:[%s2363_s30 + $0x38] sm:$0xff]  ;;  %v509_v17 = vld [vmem:[%s2369_s20 + $0x20] sm:$0xff]  ;;  %v511_v18 = vld [vmem:[%s2369_s20 + $0x30] sm:$0xff] }
  0xbd   : > { %1405 = vmatprep.subr.bf16.mxu0 %v1404_v8  ;;  %v1408_v19 = vpack.c.bf16 %v405_v16, %v403_v15  ;;  %v514_v20 = vld [vmem:[%s2369_s20 + $0x48] sm:$0xff]  ;;  %v516_v21 = vld [vmem:[%s2369_s20 + $0x58] sm:$0xff]  ;;  %v402_v22 = vld [vmem:[%s2363_s30 + $0x20] sm:$0xff]  ;;  %v1442_v24 = vpack.c.bf16 %v511_v18, %v509_v17 }
  0xbe   : > { %1441 = vmatprep.subr.bf16.mxu1 %v1440_v12  ;;  %1407 = vmatpush1.bf16.xpose.msra.mxu0 %v1406_v14  ;;  %v404_v23 = vld [vmem:[%s2363_s30 + $0x30] sm:$0xff]  ;;  %v407_v25 = vld [vmem:[%s2363_s30 + $0x48] sm:$0xff]  ;;  %v409_v26 = vld [vmem:[%s2363_s30 + $0x58] sm:$0xff]  ;;  %v1444_v27 = vpack.c.bf16 %v516_v21, %v514_v20  ;;  %p391_p10 = scmp.lt.s32.totalorder %s2700_s15, 1  ;;  %s1349_s21 = sshll.u32 %s2700_s15, 2 }
  0xbf   : > { %1409 = vmatprep.subr.bf16.mxu0 %v1408_v19  ;;  %v1410_v28 = vpack.c.bf16 %v404_v23, %v402_v22  ;;  %v1412_v29 = vpack.c.bf16 %v409_v26, %v407_v25  ;;  %v513_v30 = vld [vmem:[%s2369_s20 + $0x40] sm:$0xff]  ;;  %v515_v31 = vld [vmem:[%s2369_s20 + $0x50] sm:$0xff]  ;;  %v518_v32 = vld [vmem:[%s2369_s20 + $0x68] sm:$0xff]  ;;  %s1146_s29 = sadd.s32 %s2702_s26, %s1349_s21 }
  0xc0   : > { %v520_v33 = vld [vmem:[%s2369_s20 + $0x78] sm:$0xff]  ;;  %v406_v34 = vld [vmem:[%s2363_s30 + $0x40] sm:$0xff]  ;;  %v408_v35 = vld [vmem:[%s2363_s30 + $0x50] sm:$0xff]  ;;  %v1446_v36 = vpack.c.bf16 %v515_v31, %v513_v30  ;;  %s392_s4 = scalar_select %p391_p10, %s2700_s15, 1 }
  0xc1   : > { %v411_v37 = vld [vmem:[%s2363_s30 + $0x68] sm:$0xff]  ;;  %v413_v38 = vld [vmem:[%s2363_s30 + $0x78] sm:$0xff]  ;;  %v1448_v39 = vpack.c.bf16 %v520_v33, %v518_v32  ;;  %v1414_v40 = vpack.c.bf16 %v408_v35, %v406_v34  ;;  %v517_v43 = vld [vmem:[%s2369_s20 + $0x60] sm:$0xff]  ;;  %s1350_s7 = sshll.u32 %s1146_s29, 7 }
  0xc2   : > { %v1416_v41 = vpack.c.bf16 %v413_v38, %v411_v37  ;;  %v2406_v42 = vld [vmem:[%s2355_s13 + $0x8] sm:$0xff]  ;;  %v519_v44 = vld [vmem:[%s2369_s20 + $0x70] sm:$0xff]  ;;  %v524_v46 = vld [vmem:[%s2369_s20 + $0x98] sm:$0xff]  ;;  %s393_s25 = scalar_lea.vmem %s2701_s10, %s392_s4 }
  0xc3   : > { %601 = vmatprep.mubr.f32.mxu1 %v2406_v42  ;;  %v522_v45 = vld [vmem:[%s2369_s20 + $0x88] sm:$0xff]  ;;  %494 = vmatprep.mubr.f32.mxu0 %v2406_v42  ;;  %v410_v47 = vld [vmem:[%s2363_s30 + $0x60] sm:$0xff]  ;;  %v412_v48 = vld [vmem:[%s2363_s30 + $0x70] sm:$0xff]  ;;  %v1450_v49 = vpack.c.bf16 %v519_v44, %v517_v43 }
  0xc4   : > { %1443 = vmatpush1.bf16.xpose.msra.mxu1 %v1442_v24  ;;  %v415_v50 = vld [vmem:[%s2363_s30 + $0x88] sm:$0xff]  ;;  %v417_v51 = vld [vmem:[%s2363_s30 + $0x98] sm:$0xff]  ;;  %v1452_v52 = vpack.c.bf16 %v524_v46, %v522_v45  ;;  %v1418_v53 = vpack.c.bf16 %v412_v48, %v410_v47  ;;  %v521_v55 = vld [vmem:[%s2369_s20 + $0x80] sm:$0xff] }
  0xc5   : > { %1445 = vmatprep.subr.bf16.mxu1 %v1444_v27  ;;  %v1420_v54 = vpack.c.bf16 %v417_v51, %v415_v50  ;;  %v523_v56 = vld [vmem:[%s2369_s20 + $0x90] sm:$0xff]  ;;  %v526_v57 = vld [vmem:[%s2369_s20 + $0xa8] sm:$0xff]  ;;  %v528_v58 = vld [vmem:[%s2369_s20 + $0xb8] sm:$0xff] }
  0xc6   : > { %1411 = vmatpush1.bf16.xpose.msra.mxu0 %v1410_v28  ;;  %v414_v59 = vld [vmem:[%s2363_s30 + $0x80] sm:$0xff]  ;;  %v416_v60 = vld [vmem:[%s2363_s30 + $0x90] sm:$0xff]  ;;  %v1454_v61 = vpack.c.bf16 %v523_v56, %v521_v55  ;;  %v419_v62 = vld [vmem:[%s2363_s30 + $0xa8] sm:$0xff]  ;;  %v1456_v0 = vpack.c.bf16 %v528_v58, %v526_v57 }
  0xc7   : > { %1413 = vmatprep.subr.bf16.mxu0 %v1412_v29  ;;  %v421_v63 = vld [vmem:[%s2363_s30 + $0xb8] sm:$0xff]  ;;  %v1422_v1 = vpack.c.bf16 %v416_v60, %v414_v59  ;;  %v525_v3 = vld [vmem:[%s2369_s20 + $0xa0] sm:$0xff]  ;;  %v527_v4 = vld [vmem:[%s2369_s20 + $0xb0] sm:$0xff] }
  0xc8   : > { %v1424_v2 = vpack.c.bf16 %v421_v63, %v419_v62  ;;  %v530_v5 = vld [vmem:[%s2369_s20 + $0xc8] sm:$0xff]  ;;  %v532_v6 = vld [vmem:[%s2369_s20 + $0xd8] sm:$0xff]  ;;  %v418_v7 = vld [vmem:[%s2363_s30 + $0xa0] sm:$0xff]  ;;  %v1458_v9 = vpack.c.bf16 %v527_v4, %v525_v3 }
  0xc9   : > { %v420_v8 = vld [vmem:[%s2363_s30 + $0xb0] sm:$0xff]  ;;  %v423_v10 = vld [vmem:[%s2363_s30 + $0xc8] sm:$0xff]  ;;  %v425_v11 = vld [vmem:[%s2363_s30 + $0xd8] sm:$0xff]  ;;  %v1460_v12 = vpack.c.bf16 %v532_v6, %v530_v5 }
  0xca   : > { %v1426_v13 = vpack.c.bf16 %v420_v8, %v418_v7  ;;  %v1428_v14 = vpack.c.bf16 %v425_v11, %v423_v10  ;;  %v529_v15 = vld [vmem:[%s2369_s20 + $0xc0] sm:$0xff]  ;;  %v531_v16 = vld [vmem:[%s2369_s20 + $0xd0] sm:$0xff]  ;;  %v534_v17 = vld [vmem:[%s2369_s20 + $0xe8] sm:$0xff] }
  0xcb   : > { %v536_v18 = vld [vmem:[%s2369_s20 + $0xf8] sm:$0xff]  ;;  %v422_v19 = vld [vmem:[%s2363_s30 + $0xc0] sm:$0xff]  ;;  %v424_v20 = vld [vmem:[%s2363_s30 + $0xd0] sm:$0xff]  ;;  %v1462_v21 = vpack.c.bf16 %v531_v16, %v529_v15 }
  0xcc   : > { %1447 = vmatpush1.bf16.xpose.msra.mxu1 %v1446_v36  ;;  %v427_v22 = vld [vmem:[%s2363_s30 + $0xe8] sm:$0xff]  ;;  %v429_v23 = vld [vmem:[%s2363_s30 + $0xf8] sm:$0xff]  ;;  %v1464_v24 = vpack.c.bf16 %v536_v18, %v534_v17  ;;  %v1430_v25 = vpack.c.bf16 %v424_v20, %v422_v19  ;;  %v533_v27 = vld [vmem:[%s2369_s20 + $0xe0] sm:$0xff] }
  0xcd   : > { %1449 = vmatprep.subr.bf16.mxu1 %v1448_v39  ;;  %v1432_v26 = vpack.c.bf16 %v429_v23, %v427_v22  ;;  %v535_v28 = vld [vmem:[%s2369_s20 + $0xf0] sm:$0xff]  ;;  %v426_v29 = vld [vmem:[%s2363_s30 + $0xe0] sm:$0xff]  ;;  %v613_v32 = vld [vmem:[%s2371_s8 + $0x8] sm:$0xff]  ;;  %s2548_s20 = scalar_lea.sflag [#allocation4], %s385_s17 }
  0xce   : > { %1415 = vmatpush1.bf16.xpose.msra.mxu0 %v1414_v40  ;;  %v428_v30 = vld [vmem:[%s2363_s30 + $0xf0] sm:$0xff]  ;;  %v1466_v31 = vpack.c.bf16 %v535_v28, %v533_v27  ;;  %v615_v33 = vld [vmem:[%s2371_s8 + $0x18] sm:$0xff]  ;;  %v612_v36 = vld [vmem:[%s2371_s8] sm:$0xff]  ;;  %s2545_s30 = scalar_lea.hbm %s2703_s16, %s1350_s7 }
  0xcf   : > { %1417 = vmatprep.subr.bf16.mxu0 %v1416_v41  ;;  %v1434_v34 = vpack.c.bf16 %v428_v30, %v426_v29  ;;  %v1468_v35 = vpack.c.bf16 %v615_v33, %v613_v32  ;;  %v614_v37 = vld [vmem:[%s2371_s8 + $0x10] sm:$0xff]  ;;  %v2451_v38 = vld [vmem:[%s2355_s13] sm:$0xff]  ;;  %v617_v39 = vld [vmem:[%s2371_s8 + $0x28] sm:$0xff] }
  0xd0   : > { %v619_v40 = vld [vmem:[%s2371_s8 + $0x38] sm:$0xff]  ;;  %v1470_v43 = vpack.c.bf16 %v614_v37, %v612_v36  ;;  %v396_v45 = vld [vmem:[%s2355_s13 + $0x10] sm:$0xff]  ;;  %v616_v46 = vld [vmem:[%s2371_s8 + $0x20] sm:$0xff] }
  0xd1   : > { %v2456_v41 = vld [vmem:[%s2355_s13 + $0x18] sm:$0xff]  ;;  %v1472_v44 = vpack.c.bf16 %v619_v40, %v617_v39  ;;  %v618_v47 = vld [vmem:[%s2371_s8 + $0x30] sm:$0xff]  ;;  %v621_v48 = vld [vmem:[%s2371_s8 + $0x48] sm:$0xff]  ;;  %s387_s13 = scalar_lea.vmem [#allocation10], %s1334_s24 }
  0xd2   : > { %v1474_v50 = vpack.c.bf16 %v618_v47, %v616_v46  ;;  %v627_v55 = vld [vmem:[%s2371_s8 + $0x78] sm:$0xff]  ;;  %v624_v58 = vld [vmem:[%s2371_s8 + $0x60] sm:$0xff]  ;;  %v626_v59 = vld [vmem:[%s2371_s8 + $0x70] sm:$0xff]  ;;  %s1149_s12 = sshll.u32 %s387_s13, 4  ;;  %s2539_s12 = int_to_ptr.vmem [resolvable:$true] %s1149_s12 }
  0xd3   : > { %v631_v60 = vld [vmem:[%s2371_s8 + $0x98] sm:$0xff]  ;;  %v628_v63 = vld [vmem:[%s2371_s8 + $0x80] sm:$0xff]  ;;  %v634_v6 = vld [vmem:[%s2371_s8 + $0xb0] sm:$0xff]  ;;  %s1813_s1 = scalar_lea.vmem %s2539_s12, 256 }
  0xd4   : > { %1451 = vmatpush1.bf16.xpose.msra.mxu1 %v1450_v49  ;;  %v623_v49 = vld [vmem:[%s2371_s8 + $0x58] sm:$0xff]  ;;  %v632_v5 = vld [vmem:[%s2371_s8 + $0xa0] sm:$0xff]  ;;  %v637_v7 = vld [vmem:[%s2371_s8 + $0xc8] sm:$0xff]  ;;  %p1814_p6 = scmp.ne.s32.totalorder %s2539_s12, %s1813_s1 }
  0xd5   : > { %1453 = vmatprep.subr.bf16.mxu1 %v1452_v52  ;;  %v1476_v51 = vpack.c.bf16 %v623_v49, %v621_v48  ;;  %v620_v52 = vld [vmem:[%s2371_s8 + $0x40] sm:$0xff]  ;;  %v639_v8 = vld [vmem:[%s2371_s8 + $0xd8] sm:$0xff]  ;;  %v642_v18 = vld [vmem:[%s2371_s8 + $0xf0] sm:$0xff] }
  0xd6   : > { %1419 = vmatpush1.bf16.xpose.msra.mxu0 %v1418_v53  ;;  %v622_v53 = vld [vmem:[%s2371_s8 + $0x50] sm:$0xff]  ;;  %v1492_v10 = vpack.c.bf16 %v639_v8, %v637_v7  ;;  %v636_v11 = vld [vmem:[%s2371_s8 + $0xc0] sm:$0xff]  ;;  %vm2494_vm1 = vmpackc.low %vm728_vm0, %vm728_vm0  ;;  %p1815_p12 = pnand %p1814_p6, %p2704_p1 }
  0xd7   : > { %1421 = vmatprep.subr.bf16.mxu0 %v1420_v54  ;;  %v625_v54 = vld [vmem:[%s2371_s8 + $0x68] sm:$0xff]  ;;  %v1478_v56 = vpack.c.bf16 %v622_v53, %v620_v52  ;;  %v640_v17 = vld [vmem:[%s2371_s8 + $0xe0] sm:$0xff] }
  0xd8   : > { %v1480_v57 = vpack.c.bf16 %v627_v55, %v625_v54  ;;  %v1498_v19 = vpack.c.bf16 %v642_v18, %v640_v17  ;;  %p1816_p7 = pneg %p1815_p12 }
  0xdc   : > { %1455 = vmatpush1.bf16.xpose.msra.mxu1 %v1454_v61  ;;  %v1482_v61 = vpack.c.bf16 %v626_v59, %v624_v58 }
  0xdd   : > { %1457 = vmatprep.subr.bf16.mxu1 %v1456_v0  ;;  %v630_v0 = vld [vmem:[%s2371_s8 + $0x90] sm:$0xff] }
  0xde   : > { %1423 = vmatpush1.bf16.xpose.msra.mxu0 %v1422_v1  ;;  %v633_v1 = vld [vmem:[%s2371_s8 + $0xa8] sm:$0xff]  ;;  %v1486_v3 = vpack.c.bf16 %v630_v0, %v628_v63 }
  0xdf   : > { %1425 = vmatprep.subr.bf16.mxu0 %v1424_v2  ;;  %v635_v2 = vld [vmem:[%s2371_s8 + $0xb8] sm:$0xff] }
  0xe0   : > { %v1488_v4 = vpack.c.bf16 %v635_v2, %v633_v1 }
  0xe4   : > { %1459 = vmatpush1.bf16.xpose.msra.mxu1 %v1458_v9  ;;  %v1490_v9 = vpack.c.bf16 %v634_v6, %v632_v5 }
  0xe5   : > { %1461 = vmatprep.subr.bf16.mxu1 %v1460_v12  ;;  %v638_v12 = vld [vmem:[%s2371_s8 + $0xd0] sm:$0xff] }
  0xe6   : > { %1427 = vmatpush1.bf16.xpose.msra.mxu0 %v1426_v13  ;;  %v641_v13 = vld [vmem:[%s2371_s8 + $0xe8] sm:$0xff]  ;;  %v1494_v15 = vpack.c.bf16 %v638_v12, %v636_v11 }
  0xe7   : > { %1429 = vmatprep.subr.bf16.mxu0 %v1428_v14  ;;  %v643_v14 = vld [vmem:[%s2371_s8 + $0xf8] sm:$0xff] }
  0xe8   : > { %v1496_v16 = vpack.c.bf16 %v643_v14, %v641_v13 }
  0xec   : > { %1463 = vmatpush1.bf16.xpose.msra.mxu1 %v1462_v21 }
  0xed   : > { %1465 = vmatprep.subr.bf16.mxu1 %v1464_v24 }
  0xee   : > { %1431 = vmatpush1.bf16.xpose.msra.mxu0 %v1430_v25 }
  0xef   : > { %1433 = vmatprep.subr.bf16.mxu0 %v1432_v26 }
  0xf4   : > { %1467 = vmatpush1.bf16.xpose.msra.mxu1 %v1466_v31 }
  0xf6   : > { %1435 = vmatpush1.bf16.xpose.msra.mxu0 %v1434_v34 }
  0xf7   : > { %1469 = vmatprep.subr.bf16.mxu0 %v1468_v35 }
  0xfb   : > { %602 = vmatmul.mubr.f32.vlgmr.msra.gmra.mrb[0].mxu1 %v2451_v38 }
  0xfc   : > { %606 = vmatprep.mubr.f32.mxu1 %v2456_v41 }
  0xfd   : > { %495 = vmatmul.mubr.f32.vlgmr.msra.gmra.mrb[0].mxu0 %v2451_v38 }
  0xfe   : > { %499 = vmatprep.mubr.f32.mxu0 %v2456_v41  ;;  %1471 = vmatpush1.bf16.xpose.msra.mxu0 %v1470_v43 }
  0xff   : > { %607 = vmatmul.mubr.f32.gmra.mrb[2].mxu1 %v396_v45  ;;  %1473 = vmatprep.subr.bf16.mxu0 %v1472_v44  ;;  %v1335_v44 = vld [vmem:[%s393_s25] ss:$0 sm:$0xff] }
 0x101   : > { %500 = vmatmul.mubr.f32.gmra.mrb[2].mxu0 %v396_v45 }
 0x102   : > { %708 = vmatprep.mubr.f32.mxu0 %v2406_v42  ;;  %v629_v42 = vld [vmem:[%s2371_s8 + $0x88] sm:$0xff]  ;;  %s1976_s8 = smov [#allocation10]  }
 0x103   : > { %v1484_v62 = vpack.c.bf16 %v631_v60, %v629_v42 }
 0x106   : > { %1475 = vmatpush1.bf16.xpose.msra.mxu0 %v1474_v50 }
 0x107   : > { %1477 = vmatprep.subr.bf16.mxu0 %v1476_v51 }
 0x10e   : > { %1479 = vmatpush1.bf16.xpose.msra.mxu0 %v1478_v56 }
 0x10f   : > { %1481 = vmatprep.subr.bf16.mxu0 %v1480_v57 }
 0x116   : > { %1483 = vmatpush1.bf16.xpose.msra.mxu0 %v1482_v61 }
 0x117   : > { %1485 = vmatprep.subr.bf16.mxu0 %v1484_v62 }
 0x11e   : > { %1487 = vmatpush1.bf16.xpose.msra.mxu0 %v1486_v3 }
 0x11f   : > { %1489 = vmatprep.subr.bf16.mxu0 %v1488_v4 }
 0x126   : > { %1491 = vmatpush1.bf16.xpose.msra.mxu0 %v1490_v9 }
 0x127   : > { %1493 = vmatprep.subr.bf16.mxu0 %v1492_v10 }
 0x12e   : > { %1495 = vmatpush1.bf16.xpose.msra.mxu0 %v1494_v15 }
 0x12f   : > { %1497 = vmatprep.subr.bf16.mxu0 %v1496_v16 }
 0x136   : > { %1499 = vmatpush1.bf16.xpose.msra.mxu0 %v1498_v19 }
 0x13d   : > { %709 = vmatmul.mubr.f32.vlgmr.msra.gmra.mrb[4].mxu0 %v2451_v38 }
 0x13e   : > { %713 = vmatprep.mubr.f32.mxu0 %v2456_v41 }
 0x141   : > { %714 = vmatmul.mubr.f32.gmra.mrb[6].mxu0 %v396_v45 }
 0x1ce   : > { %v603_v20 = vpop.f32.mrb[0].mxu1 }
 0x1cf   : > { %v605_v21 = vpop.f32.mrb[1].mxu1 }
 0x1d0   : > { %v496_v22 = vpop.f32.mrb[0].mxu0 }
 0x1d1   : > { %v719_v23 = vmul.f32 0.125, %v496_v22  ;;  %v498_v24 = vpop.f32.mrb[1].mxu0 }
 0x1d2   : > { %v608_v25 = vpop.f32.mrb[2].mxu1 }
 0x1d3   : > { %v1500_v27 = vpack.c.bf16 %v608_v25, %v603_v20  ;;  %v610_v28 = vpop.f32.mrb[3].mxu1  ;;  %v1667_v29 = vpack.i.bf16 %v608_v25, %v603_v20  ;;  %1380 = vmatprep.mubr.msk.f32.mxu1 %vm728_vm0, %v719_v23 }
 0x1d4   : > { %v501_v30 = vpop.f32.mrb[2].mxu0 }
 0x1d5   : > { %1668 = vrot.lane.b32.xlu1 %v1667_v29, %s1975_s11  ;;  %1502 = vmatprep.subr.msk.bf16.mxu1 %vm2494_vm1, %v1500_v27  ;;  %v503_v31 = vpop.f32.mrb[3].mxu0  ;;  %v720_v32 = vmul.f32 0.125, %v501_v30 }
 0x1d6   : > { %1505 = vmatpush3.bf16.xpose.msk.msra.mxu1 %vm2494_vm1, %v1500_v27 }
 0x1d9   : > { %920 = vrot.lane.b32.xlu1 %v719_v23, %s1975_s11 }
 0x1dd   : > { %1381 = vmatmul.mubr.msk.f32.vlgmr.msra.gmra.mrb[4].mxu1 %vm728_vm0, %v720_v32 }
 0x210   : > { %v710_v33 = vpop.f32.mrb[4].mxu0 }
 0x211   : > { %v712_v34 = vpop.f32.mrb[5].mxu0 }
 0x214   : > { %v715_v35 = vpop.f32.mrb[6].mxu0 }
 0x215   : > { %v1672_v36 = vpack.i.bf16 %v715_v35, %v710_v33  ;;  %v1506_v37 = vpack.c.bf16 %v715_v35, %v710_v33  ;;  %v717_v38 = vpop.f32.mrb[7].mxu0 }
 0x217   : > { %1507 = vmatprep.subr.bf16.mxu1 %v1506_v37 }
 0x218   : > { %1509 = vmatpush3.bf16.msra.mxu1 %v1506_v37 }
 0x247   : > { %v1669_v39 = vpop.permute.xlu1 %1668 }
 0x248   : > { %v1671_v40 = vunpack.i.h.bf16 %v1669_v39  ;;  %v1670_v41 = vunpack.i.l.bf16 %v1669_v39 }
 0x24a   : > { %v1510_v43 = vpack.c.bf16 %v1671_v40, %v1670_v41 }
 0x24b   : > { %v921_v59 = vpop.permute.xlu1 %920 }
 0x24c   : > { %1512 = vmatprep.subr.msk.bf16.mxu1 %vm2494_vm1, %v1510_v43 }
 0x2b0   : > { %v1382_v45 = vpop.f32.mrb[4].mxu1 }
 0x2b1   : > { %v807_v46 = vpop.f32.mrb[5].mxu1  ;;  %v813_v48 = vadd.f32 %v1382_v45, %v1335_v44 }
 0x2b2   : > { %v808_v47 = vadd.f32 %v1335_v44, %v807_v46 }
 0x2b3   : > { %v820_v50 = vsel %vm816_vm2, %v813_v48, -inf }
 0x2b4   : > { %v817_v49 = vsel %vm816_vm2, %v808_v47, -inf }
 0x2b5   : > { %818 = vmax.xlane.f32.xlu0 %v817_v49 }
 0x2b9   : > { %821 = vmax.xlane.f32.xlu0 %v820_v50 }
 0x2cf   : > { %922 = vrot.lane.b32.xlu0 %v720_v32, %s1975_s11 }
 0x342   : > { %v819_v51 = vpop.xlane.xlu0 %818 }
 0x343   : > { %v823_v52 = vsub.f32 %v808_v47, %v819_v51 }
 0x345   : > { %v825_v53 = vmul.f32 1.442695, %v823_v52 }
 0x346   : > { %v822_v54 = vpop.xlane.xlu0 %821 }
 0x347   : > { %1677 = vpow2.f32 %v825_v53  ;;  %v824_v55 = vsub.f32 %v813_v48, %v822_v54 }
 0x349   : > { %v827_v56 = vmul.f32 1.442695, %v824_v55 }
 0x34a   : > { %v923_v42 = vpop.permute.xlu0 %922 }
 0x34b   : > { %1679 = vpow2.f32 %v827_v56 }
 0x351   : > { %v1678_v57 = vpop.eup %1677 }
 0x352   : > { %1387 = vmatprep.mubr.msk.f32.mxu1 %vm816_vm2, %v1678_v57  ;;  %v829_v18 = vsel %vm816_vm2, %v1678_v57, 0.0 }
 0x355   : > { %v1680_v58 = vpop.eup %1679 }
 0x356   : > { %1388 = vmatmul.mubr.msk.f32.vlgmr.msra.gmra.mrb[6].mxu1 %vm816_vm2, %v1680_v58  ;;  %v832_v19 = vsel %vm816_vm2, %v1680_v58, 0.0 }
 0x357   : > { %1515 = vmatpush3.bf16.xpose.msk.msra.mxu1 %vm2494_vm1, %v1510_v43  ;;  %1394 = vmatprep.mubr.msk.f32.mxu1 %vm728_vm0, %v921_v59 }
 0x35e   : > { %1395 = vmatmul.mubr.msk.f32.vlgmr.msra.gmra.mrb[8].mxu1 %vm728_vm0, %v923_v42 }
 0x429   : > { %v2522_v60 = vpop.f32.mrb[6].mxu1 }
 0x42a   : > { %v907_v61 = vpop.f32.mrb[7].mxu1 }
 0x431   : > { %v1396_v62 = vpop.f32.mrb[8].mxu1 }
 0x432   : > { %v1008_v63 = vadd.f32 %v1396_v62, %v1335_v44  ;;  %v1002_v0 = vpop.f32.mrb[9].mxu1 }
 0x433   : > { %v1003_v1 = vadd.f32 %v1335_v44, %v1002_v0 }
 0x434   : > { %v1014_v2 = vsel %vm816_vm2, %v1008_v63, -inf }
 0x435   : > { %1015 = vmax.xlane.f32.xlu0 %v1014_v2  ;;  %v1011_v3 = vsel %vm816_vm2, %v1003_v1, -inf }
 0x436   : > { %1012 = vmax.xlane.f32.xlu1 %v1011_v3 }
 0x447   : > { %1673 = vrot.lane.b32.xlu1 %v1672_v36, %s1975_s11 }
 0x4c2   : > { %v1016_v4 = vpop.xlane.xlu0 %1015 }
 0x4c3   : > { %v1018_v5 = vsub.f32 %v1008_v63, %v1016_v4  ;;  %v1013_v6 = vpop.xlane.xlu1 %1012 }
 0x4c4   : > { %v1017_v7 = vsub.f32 %v1003_v1, %v1013_v6 }
 0x4c5   : > { %v1021_v8 = vmul.f32 1.442695, %v1018_v5 }
 0x4c6   : > { %v1019_v9 = vmul.f32 1.442695, %v1017_v7 }
 0x4c7   : > { %1681 = vpow2.f32 %v1021_v8  ;;  %v1674_v10 = vpop.permute.xlu1 %1673 }
 0x4c8   : > { %1683 = vpow2.f32 %v1019_v9  ;;  %v1676_v11 = vunpack.i.h.bf16 %v1674_v10  ;;  %v1675_v12 = vunpack.i.l.bf16 %v1674_v10 }
 0x4ca   : > { %v1516_v13 = vpack.c.bf16 %v1676_v11, %v1675_v12 }
 0x4cc   : > { %1517 = vmatprep.subr.bf16.mxu1 %v1516_v13 }
 0x4cd   : > { %1519 = vmatpush3.bf16.msra.mxu1 %v1516_v13 }
 0x4d1   : > { %v1682_v14 = vpop.eup %1681 }
 0x4d2   : > { %v1684_v15 = vpop.eup %1683  ;;  %v1026_v16 = vsel %vm816_vm2, %v1682_v14, 0.0 }
 0x4d3   : > { %1027 = vadd.xlane.f32.xlu1 %v1026_v16  ;;  %1401 = vmatprep.mubr.msk.f32.mxu1 %vm816_vm2, %v1684_v15  ;;  %v1023_v17 = vsel %vm816_vm2, %v1684_v15, 0.0 }
 0x4d4   : > { %1024 = vadd.xlane.f32.xlu0 %v1023_v17  ;;  %1402 = vmatmul.mubr.msk.f32.vlgmr.msra.gmra.mrb[10].mxu1 %vm816_vm2, %v1682_v14 }
 0x4d8   : > { %830 = vadd.xlane.f32.xlu0 %v829_v18 }
 0x4dc   : > { %833 = vadd.xlane.f32.xlu0 %v832_v19 }
 0x560   : > { %v1028_v21 = vpop.xlane.xlu1 %1027 }
 0x561   : > { %v1025_v20 = vpop.xlane.xlu0 %1024 }
 0x562   : > { %1685 = vrcp.f32 %v1025_v20 }
 0x563   : > { %1687 = vrcp.f32 %v1028_v21 }
 0x565   : > { %v831_v28 = vpop.xlane.xlu0 %830 }
 0x566   : > { %1689 = vrcp.f32 %v831_v28 }
 0x569   : > { %v834_v29 = vpop.xlane.xlu0 %833 }
 0x56a   : > { %1691 = vrcp.f32 %v834_v29 }
 0x56c   : > { %v1686_v23 = vpop.eup %1685 }
 0x56d   : > { %v1688_v26 = vpop.eup %1687 }
 0x570   : > { %v1690_v30 = vpop.eup %1689 }
 0x571   : > { %v918_v31 = vmul.f32 %v1690_v30, %v907_v61 }
 0x574   : > { %v1692_v32 = vpop.eup %1691 }
 0x575   : > { %v919_v35 = vmul.f32 %v1692_v32, %v2522_v60 }
 0x5a7   : > { %v1403_v22 = vpop.f32.mrb[10].mxu1 }
 0x5a8   : > { %v1109_v24 = vpop.f32.mrb[11].mxu1  ;;  %v1121_v27 = vmul.f32 %v1688_v26, %v1403_v22 }
 0x5a9   : > { %v1120_v25 = vmul.f32 %v1686_v23, %v1109_v24 }
 0x5ab   : > { %1124 = vrot.lane.b32.xlu0 %v1120_v25, %s1975_s11 }
 0x5af   : > { %1126 = vrot.lane.b32.xlu0 %v1121_v27, %s1975_s11  ;;  %s1817_s11 = sshll.u32 %s1976_s8, 4  ;;  %s1818_s11 = int_to_ptr.vmem [resolvable:$false] %s1817_s11 }
 0x5b0   : > { %s1819_s15 = scalar_lea.vmem %s1818_s11, 512  ;;  %p1820_p3 = scmp.lt.s32.totalorder %s2539_s12, %s1818_s11 }
 0x5b1   : > { %p1821_p0 = scmp.lt.s32.totalorder %s1819_s15, %s1813_s1 }
 0x5b3   : > { %p1822_p4 = por %p1821_p0, %p1820_p3 }
 0x5b5   : > { %p1823_p9 = pnand %p1822_p4, %p1816_p7 }
 0x61d   : > { %v1125_v33 = vpop.permute.xlu0 %1124 }
 0x61e   : > { %v1130_v34 = vsel %vm728_vm0, %v918_v31, %v1125_v33 }
 0x61f   : > { %1132 = vst [vmem:[%s387_s13] sm:$0xff] %v1130_v34 }
 0x621   : > { %v1127_v36 = vpop.permute.xlu0 %1126 }
 0x622   : > { %v1131_v37 = vsel %vm728_vm0, %v919_v35, %v1127_v36 }
 0x623   : > { %1133 = vst [vmem:[%s387_s13 + $0x8] sm:$0xff] %v1131_v37 }
 0x624   : > { %1826 = shalt.err (!%p1823_p9)
}
 0x625   : > { %s1827_s4 = scalar_lea.hbm %s2545_s30, 256  ;;  %s1831_s10 = scalar_lea.hbm %s2703_s16, 1024 }
 0x626   : > { %p1828_p8 = scmp.ne.s32.totalorder %s2545_s30, %s1827_s4  ;;  %p1832_p13 = scmp.lt.u32.totalorder %s2545_s30, %s2703_s16 }
 0x627   : > { %p1833_p2 = scmp.lt.u32.totalorder %s1831_s10, %s1827_s4  ;;  %p1835_p6 = scmp.lt.u32.totalorder %s1827_s4, %s2545_s30 }
 0x628   : > { %p1829_p5 = pnand %p1828_p8, %p2704_p1 }
 0x629   : > { %p1834_p10 = por %p1833_p2, %p1832_p13 }
 0x62a   : > { %p1830_p11 = pneg %p1829_p5 }
 0x62b   : > { %p1836_p12 = por %p1835_p6, %p1834_p10 }
 0x62d   : > { %p1837_p7 = pnand %p1836_p12, %p1830_p11 }
 0x62f   : > { %1840 = shalt.err (!%p1837_p7)
}
 0x630   : > { %s1977_s17 = smov 128   ;;  %s1978_s21 = smov 256  }
 0x631   : > { %s1979_s24 = smov 8  }
 0x632   : > { %1528 = dma.vmem_to_hbm [thread:$0]  (%p2704_p1), %s2539_s12, 256, %s2545_s30, %s2548_s20, %s1977_s17, %s1978_s21, %s1979_s24  }
 0x633 PF: > { %s2705_s29 = sld [smem:[#allocation28_spill]]  ;;  %p1548_p3 = scmp.ge.s32.totalorder %s1967_s6, 2 }
 0x634   : > { %s1164_s13 = sand.u32 1, %s1915_s18  }
 0x635   : > { %s1165_s7 = scalar_lea.sflag [#allocation4], %s1164_s13 }
 0x639   : > { %p2706_p0 = scmp.ne.s32.totalorder %s2705_s29, 0 }
 0x63b   : > { %p1544_p4 = pnand %p1548_p3, %p2706_p0 }
 0x63d   : > { %1910 = dma.done.wait (!%p1544_p4), %s1165_s7, 256  }
 0x63e   : > { %1912 = vsyncadd (!%p1544_p4), %s1165_s7, 4294967040  ;;  %s27_s6 = sadd.s32 1, %s1967_s6   ;;  %s2708_s9 = sld [smem:[#allocation15_spill]] }
 0x63f   : > { %p2577_p9 = scmp.ge.s32.totalorder %s27_s6, 6   ;;  %s2709_s20 = sld [smem:[#allocation27_spill]] }
 0x640   : > { %s2710_s12 = sld [smem:[#allocation23_spill]]  ;;  %s2711_s24 = sld [smem:[#allocation16_spill]] }
 0x641   : > { %s2712_s25 = sld [smem:[#allocation17_spill]]  ;;  %s2713_s26 = sld [smem:[#allocation26_spill]] }
 0x642   : > { %s2714_s5 = sld [smem:[#allocation20_spill]]  ;;  %s2715_s28 = sld [smem:[#allocation21_spill]] }
 0x643   : > { %s2716_s29 = sld [smem:[#allocation22_spill]]  ;;  %s2717_s30 = sld [smem:[#allocation24_spill]] }
 0x644   : > { %s2719_s18 = smov %s1919_s19  ;;  %s2720_s19 = smov %s2708_s9 }
 0x645   : > { %s2721_s21 = smov %s1931_s22  ;;  %s2722_s22 = smov %s1935_s23 }
 0x646   : > { %s2723_s23 = smov %s2710_s12  ;;  %26 = sbr.rel (!%p2577_p9) target bundleno = 18 (0x12), region = 125 }
 0x648   : > { %s2724_s27 = smov %s2714_s5 }
 0x64d   :  { %1170 = vsyncpa [#allocation3], 1 }
 0x64e   :  { %1172 = vsyncpa [#allocation3 + $0x1], 1 }
 0x64f   :  { %1173 = vsyncpa [#allocation6], 1 }
 0x650   :  { %1175 = vsyncpa [#allocation6 + $0x1], 1 }
 0x651   :  { %1176 = vsyncpa [#allocation9], 1 }
 0x652   :  { %1178 = vsyncpa [#allocation9 + $0x1], 1 }
 0x653   :  { %1179 = vsyncpa [#allocation4], 1 }
 0x654   :  { %1181 = vsyncpa [#allocation4 + $0x1], 1 }

</bundles_post_ra>
